<compile_context>
chip_gen: v7x
topology: tpu7x:2x2x1
jax: 0.10.0
libtpu: 0.0.40
codegen_flags: <defaults>
</compile_context>

<pallas_src>
import functools

import jax
import jax.numpy as jnp
from jax.experimental import pallas as pl
from jax.experimental.pallas import tpu as pltpu


def _matmul_bias_relu_single_k_kernel(x_ref, w_ref, b_ref, o_ref):
    # Whole contraction dim in one tile: dot -> +bias -> ReLU -> store.
    out = jnp.dot(x_ref[...], w_ref[...], preferred_element_type=jnp.float32)
    out = out + b_ref[...]
    o_ref[...] = jnp.maximum(out, 0.0).astype(o_ref.dtype)


def _matmul_bias_relu_kernel(x_ref, w_ref, b_ref, o_ref, acc_ref):
    # x_ref: (tm, tk)   im2col patch tile
    # w_ref: (tk, tn)   flattened weight tile
    # b_ref: (1, tn)    bias tile (f32)
    # o_ref: (tm, tn)   output tile (lane-dense: tn is a multiple of 128)
    # acc_ref: (tm, tn) f32 accumulator scratch, resident across the k axis
    k = pl.program_id(2)

    @pl.when(k == 0)
    def _():
        # Fold the bias into the accumulator init (saves the final add).
        acc_ref[...] = jnp.broadcast_to(b_ref[...], acc_ref.shape)

    acc_ref[...] += jnp.dot(x_ref[...], w_ref[...],
                            preferred_element_type=jnp.float32)

    @pl.when(k == pl.num_programs(2) - 1)
    def _():
        o_ref[...] = jnp.maximum(acc_ref[...], 0.0).astype(o_ref.dtype)


def _round_up(x, m):
    return ((x + m - 1) // m) * m


def _pick_tile(padded_dim, candidates):
    for c in candidates:
        if c <= padded_dim and padded_dim % c == 0:
            return c
    return candidates[-1]


@functools.partial(jax.jit,
                   static_argnames=("padding", "stride", "compute_dtype"))
def conv_module_forward(x_nchw, weight_oikk, bias_o, *, padding=1, stride=1,
                        compute_dtype=None):
    """ConvModule.forward for dilation=1, groups=1, bias=True,
    normalize=None, activation='relu', activate_last=True."""
    N, Cin, H, W = x_nchw.shape
    Cout, _, KH, KW = weight_oikk.shape
    OH = (H + 2 * padding - KH) // stride + 1
    OW = (W + 2 * padding - KW) // stride + 1

    # ---- wrapper glue: layout + pad + im2col (plain JAX, done once) --------
    x_nhwc = jnp.transpose(x_nchw, (0, 2, 3, 1))                     # N,H,W,Cin
    x_pad = jnp.pad(x_nhwc,
                    ((0, 0), (padding, padding), (padding, padding), (0, 0)))

    # im2col: (N*OH*OW, KH*KW*Cin), kh-major / kw / cin-minor ordering.
    cols = [x_pad[:,
                  kh:kh + (OH - 1) * stride + 1:stride,
                  kw:kw + (OW - 1) * stride + 1:stride, :]
            for kh in range(KH) for kw in range(KW)]
    patches = jnp.concatenate(cols, axis=-1).reshape(N * OH * OW, KH * KW * Cin)

    # weight OIHW -> (KH, KW, Cin, Cout) -> (KH*KW*Cin, Cout): same ordering.
    w_mat = jnp.transpose(weight_oikk, (2, 3, 1, 0)).reshape(KH * KW * Cin, Cout)

    if compute_dtype is not None:                # bf16 operands on v6e/v7x
        patches = patches.astype(compute_dtype)
        w_mat = w_mat.astype(compute_dtype)

    # ---- pad to MXU / lane-friendly tiles ----------------------------------
    M, K = patches.shape
    tile_m = min(512, _round_up(M, 8))           # roofline sweet spot
    M_pad = _round_up(M, tile_m)

    N_pad = _round_up(Cout, 128)                 # lane-dense output stores
    tile_n = _pick_tile(N_pad, (256, 128))

    K_pad = _round_up(K, 128)
    tile_k = _pick_tile(K_pad, (512, 384, 256, 128))

    patches_p = jnp.pad(patches, ((0, M_pad - M), (0, K_pad - K)))
    w_p = jnp.pad(w_mat, ((0, K_pad - K), (0, N_pad - Cout)))
    b_p = jnp.pad(bias_o.astype(jnp.float32), (0, N_pad - Cout)).reshape(1, N_pad)

    single_k = (K_pad == tile_k)

    if single_k:
        # Fast path: whole contraction in one tile, no accumulator scratch.
        grid = (M_pad // tile_m, N_pad // tile_n)
        out_flat = pl.pallas_call(
            _matmul_bias_relu_single_k_kernel,
            out_shape=jax.ShapeDtypeStruct((M_pad, N_pad), x_nchw.dtype),
            grid_spec=pltpu.PrefetchScalarGridSpec(
                num_scalar_prefetch=0,
                grid=grid,
                in_specs=[
                    pl.BlockSpec((tile_m, tile_k), lambda i, j: (i, 0)),
                    pl.BlockSpec((tile_k, tile_n), lambda i, j: (0, j)),
                    pl.BlockSpec((1, tile_n), lambda i, j: (0, j)),
                ],
                out_specs=pl.BlockSpec((tile_m, tile_n), lambda i, j: (i, j)),
            ),
            compiler_params=pltpu.CompilerParams(
                dimension_semantics=("parallel", "parallel"),
                vmem_limit_bytes=32 * 1024 * 1024,
            ),
        )(patches_p, w_p, b_p)
    else:
        grid = (M_pad // tile_m, N_pad // tile_n, K_pad // tile_k)
        out_flat = pl.pallas_call(
            _matmul_bias_relu_kernel,
            out_shape=jax.ShapeDtypeStruct((M_pad, N_pad), x_nchw.dtype),
            grid_spec=pltpu.PrefetchScalarGridSpec(
                num_scalar_prefetch=0,
                grid=grid,
                in_specs=[
                    pl.BlockSpec((tile_m, tile_k), lambda i, j, k: (i, k)),
                    pl.BlockSpec((tile_k, tile_n), lambda i, j, k: (k, j)),
                    pl.BlockSpec((1, tile_n), lambda i, j, k: (0, j)),
                ],
                out_specs=pl.BlockSpec((tile_m, tile_n), lambda i, j, k: (i, j)),
                scratch_shapes=[pltpu.VMEM((tile_m, tile_n), jnp.float32)],
            ),
            compiler_params=pltpu.CompilerParams(
                dimension_semantics=("parallel", "parallel", "arbitrary"),
                vmem_limit_bytes=32 * 1024 * 1024,   # safe on v5e/v6e/v7x
            ),
        )(patches_p, w_p, b_p)

    # trim padding, restore NCHW
    out = out_flat[:M, :Cout].reshape(N, OH, OW, Cout)
    return jnp.transpose(out, (0, 3, 1, 2))


def _reference(x_nchw, weight_oikk, bias_o, padding=1, stride=1):
    out = jax.lax.conv_general_dilated(
        x_nchw, weight_oikk,
        window_strides=(stride, stride),
        padding=[(padding, padding), (padding, padding)],
        dimension_numbers=("NCHW", "OIHW", "NCHW"))
    out = out + bias_o.reshape(1, -1, 1, 1)
    return jnp.maximum(out, 0.0)


if __name__ == "__main__":
    key = jax.random.PRNGKey(0)
    k_x, k_w, k_b = jax.random.split(key, 3)

    N, Cin, H, W = 2, 4, 16, 16
    Cout, K, pad = 8, 3, 1

    x = jax.random.normal(k_x, (N, Cin, H, W), dtype=jnp.float32)
    fan_in = Cin * K * K
    weight = jax.random.normal(k_w, (Cout, Cin, K, K), dtype=jnp.float32) / jnp.sqrt(fan_in)
    bias = jax.random.normal(k_b, (Cout,), dtype=jnp.float32) * 0.1

    out = conv_module_forward(x, weight, bias, padding=pad)
    out = jax.block_until_ready(out)

    ref = _reference(x, weight, bias, padding=pad)
    assert out.shape == (N, Cout, H, W), out.shape
    assert jnp.allclose(out, ref, atol=1e-4, rtol=1e-4), "mismatch vs reference conv"

    # Also exercise the multi-K-tile (accumulator) path with a larger Cin.
    Cin2, Cout2 = 64, 32
    x2 = jax.random.normal(k_x, (1, Cin2, 8, 8), dtype=jnp.float32)
    w2 = jax.random.normal(k_w, (Cout2, Cin2, 3, 3), dtype=jnp.float32) / jnp.sqrt(Cin2 * 9)
    b2 = jax.random.normal(k_b, (Cout2,), dtype=jnp.float32) * 0.1
    out2 = jax.block_until_ready(conv_module_forward(x2, w2, b2, padding=1))
    ref2 = _reference(x2, w2, b2, padding=1)
    assert jnp.allclose(out2, ref2, atol=1e-4, rtol=1e-4), "mismatch (multi-K path)"

    print("KERNEL_OK")
</pallas_src>

<mosaic_0001>
module attributes {stable_mosaic.version = 11 : i64} {
  func.func @_matmul_bias_relu_single_k_kernel(%arg0: i32, %arg1: i32, %arg2: memref<512x128xf32, #tpu.memory_space<vmem>>, %arg3: memref<128x128xf32, #tpu.memory_space<vmem>>, %arg4: memref<1x128xf32, #tpu.memory_space<vmem>>, %arg5: memref<512x128xf32, #tpu.memory_space<vmem>>) attributes {dimension_semantics = [#tpu.dimension_semantics<parallel>, #tpu.dimension_semantics<parallel>], iteration_bounds = array<i64: 1, 1>, scalar_prefetch = 0 : i64, scratch_operands = 0 : i64, tpu.core_type = #tpu.core_type<tc>, window_params = [{transform_indices = @transform_0, window_bounds = array<i64: 512, 128>}, {transform_indices = @transform_1, window_bounds = array<i64: 128, 128>}, {transform_indices = @transform_2, window_bounds = array<i64: 1, 128>}, {transform_indices = @transform_3, window_bounds = array<i64: 512, 128>}]} {
    %c0 = arith.constant 0 : index
    %c0_0 = arith.constant 0 : index
    %0 = vector.load %arg2[%c0, %c0_0] : memref<512x128xf32, #tpu.memory_space<vmem>>, vector<512x128xf32>
    %c0_1 = arith.constant 0 : index
    %c0_2 = arith.constant 0 : index
    %1 = vector.load %arg3[%c0_1, %c0_2] : memref<128x128xf32, #tpu.memory_space<vmem>>, vector<128x128xf32>
    %cst = arith.constant dense<0.000000e+00> : vector<512x128xf32>
    %2 = tpu.matmul %0, %1, %cst {dimension_numbers = #tpu.dot_dimension_numbers<[1], [0], [0], [1], [0, 0, 1, 1], [], []>} : vector<512x128xf32>, vector<128x128xf32>, vector<512x128xf32> -> vector<512x128xf32>
    %c0_3 = arith.constant 0 : index
    %c0_4 = arith.constant 0 : index
    %3 = vector.load %arg4[%c0_3, %c0_4] : memref<1x128xf32, #tpu.memory_space<vmem>>, vector<1x128xf32>
    %4 = vector.broadcast %3 : vector<1x128xf32> to vector<512x128xf32>
    %5 = arith.addf %2, %4 : vector<512x128xf32>
    %cst_5 = arith.constant 0.000000e+00 : f32
    %6 = vector.broadcast %cst_5 : f32 to vector<512x128xf32>
    %7 = arith.maximumf %5, %6 : vector<512x128xf32>
    %c0_6 = arith.constant 0 : index
    %c0_7 = arith.constant 0 : index
    %8 = vector.load %arg5[%c0_6, %c0_7] : memref<512x128xf32, #tpu.memory_space<vmem>>, vector<512x128xf32>
    tpu.vector_store %arg5[%c0_6, %c0_7], %7 {strides = array<i32>} : memref<512x128xf32, #tpu.memory_space<vmem>>, vector<512x128xf32>,
    return
  }
  func.func @transform_0(%arg0: i32, %arg1: i32) -> (i32, i32) {
    %c0_i32 = arith.constant 0 : i32
    %c0_i32_0 = arith.constant 0 : i32
    return %arg0, %c0_i32 : i32, i32
  }
  func.func @transform_1(%arg0: i32, %arg1: i32) -> (i32, i32) {
    %c0_i32 = arith.constant 0 : i32
    %c0_i32_0 = arith.constant 0 : i32
    return %c0_i32, %arg1 : i32, i32
  }
  func.func @transform_2(%arg0: i32, %arg1: i32) -> (i32, i32) {
    %c0_i32 = arith.constant 0 : i32
    %c0_i32_0 = arith.constant 0 : i32
    return %c0_i32, %arg1 : i32, i32
  }
  func.func @transform_3(%arg0: i32, %arg1: i32) -> (i32, i32) {
    %c0_i32 = arith.constant 0 : i32
    return %arg0, %arg1 : i32, i32
  }
}

</mosaic_0001>

<bundles_post_ra>
// kernel: conv_module_forward.1
= control target key start
LH: loop header
LB: loop body
LE: loop exit
PB: predicated region body
PF: predicated region fallthrough
CT: control target
= control target key end

     0   :  { %s1396_s1 = inlined_call_operand.vmem [shape: f32[128,128], index: 1, kind: input, shape index: {}]   ;;  %s1397_s0 = inlined_call_operand.vmem [shape: f32[512,128], index: 0, kind: input, shape index: {}]   ;;  %s1398_s2 = inlined_call_operand.vmem [shape: f32[1,128], index: 2, kind: input, shape index: {}]   ;;  %s1399_s3 = inlined_call_operand.vmem [shape: f32[512,128], index: 3, kind: output, shape index: {}]  }
   0x1   :  { %v78_v0 = vld [vmem:[%s1396_s1] sm:$0xff]  ;;  %v79_v1 = vld [vmem:[%s1396_s1 + $0x8] sm:$0xff]  ;;  %v80_v2 = vld [vmem:[%s1396_s1 + $0x10] sm:$0xff] }
   0x2   :  { %v827_v3 = vpack.c.bf16 %v79_v1, %v78_v0  ;;  %v81_v4 = vld [vmem:[%s1396_s1 + $0x18] sm:$0xff]  ;;  %v82_v6 = vld [vmem:[%s1396_s1 + $0x20] sm:$0xff]  ;;  %v83_v7 = vld [vmem:[%s1396_s1 + $0x28] sm:$0xff] }
   0x3   :  { %v831_v5 = vpack.c.bf16 %v81_v4, %v80_v2  ;;  %v835_v8 = vpack.c.bf16 %v83_v7, %v82_v6  ;;  %v14_v9 = vld [vmem:[%s1397_s0] sm:$0xff]  ;;  %v84_v11 = vld [vmem:[%s1396_s1 + $0x30] sm:$0xff]  ;;  %v85_v12 = vld [vmem:[%s1396_s1 + $0x38] sm:$0xff] }
   0x4   :  { %828 = vmatprep.subr.bf16.mxu0 %v827_v3  ;;  %859 = vmatprep.subr.bf16.mxu1 %v827_v3  ;;  %v46_v10 = vld [vmem:[%s1397_s0 + $0x100] sm:$0xff]  ;;  %v839_v13 = vpack.c.bf16 %v85_v12, %v84_v11  ;;  %v87_v15 = vld [vmem:[%s1396_s1 + $0x48] sm:$0xff]  ;;  %v88_v17 = vld [vmem:[%s1396_s1 + $0x50] sm:$0xff] }
   0x5   :  { %830 = vmatpush3.bf16.msra.mxu0 %v827_v3  ;;  %867 = vmatpush3.bf16.msra.mxu1 %v827_v3  ;;  %v86_v14 = vld [vmem:[%s1396_s1 + $0x40] sm:$0xff]  ;;  %v89_v18 = vld [vmem:[%s1396_s1 + $0x58] sm:$0xff]  ;;  %v91_v21 = vld [vmem:[%s1396_s1 + $0x68] sm:$0xff] }
   0x6   :  { %832 = vmatprep.subr.bf16.mxu0 %v831_v5  ;;  %860 = vmatprep.subr.bf16.mxu1 %v831_v5  ;;  %v843_v16 = vpack.c.bf16 %v87_v15, %v86_v14  ;;  %v847_v19 = vpack.c.bf16 %v89_v18, %v88_v17  ;;  %v90_v20 = vld [vmem:[%s1396_s1 + $0x60] sm:$0xff]  ;;  %v92_v23 = vld [vmem:[%s1396_s1 + $0x70] sm:$0xff]  ;;  %v93_v24 = vld [vmem:[%s1396_s1 + $0x78] sm:$0xff] }
   0x7   :  { %731 = vmatprep.mubr.f32.mxu0 %v14_v9  ;;  %779 = vmatprep.mubr.f32.mxu1 %v46_v10  ;;  %v851_v22 = vpack.c.bf16 %v91_v21, %v90_v20  ;;  %v855_v25 = vpack.c.bf16 %v93_v24, %v92_v23  ;;  %v15_v26 = vld [vmem:[%s1397_s0 + $0x8] sm:$0xff]  ;;  %v16_v28 = vld [vmem:[%s1397_s0 + $0x10] sm:$0xff]  ;;  %v17_v30 = vld [vmem:[%s1397_s0 + $0x18] sm:$0xff] }
   0x8   :  { %v47_v27 = vld [vmem:[%s1397_s0 + $0x108] sm:$0xff]  ;;  %v48_v29 = vld [vmem:[%s1397_s0 + $0x110] sm:$0xff]  ;;  %v49_v31 = vld [vmem:[%s1397_s0 + $0x118] sm:$0xff] }
   0x9   :  { %834 = vmatpush3.bf16.msra.mxu0 %v831_v5  ;;  %868 = vmatpush3.bf16.msra.mxu1 %v831_v5  ;;  %v18_v32 = vld [vmem:[%s1397_s0 + $0x20] sm:$0xff]  ;;  %v19_v34 = vld [vmem:[%s1397_s0 + $0x28] sm:$0xff]  ;;  %v20_v36 = vld [vmem:[%s1397_s0 + $0x30] sm:$0xff] }
   0xa   :  { %836 = vmatprep.subr.bf16.mxu0 %v835_v8  ;;  %861 = vmatprep.subr.bf16.mxu1 %v835_v8  ;;  %v50_v33 = vld [vmem:[%s1397_s0 + $0x120] sm:$0xff]  ;;  %v51_v35 = vld [vmem:[%s1397_s0 + $0x128] sm:$0xff]  ;;  %v52_v37 = vld [vmem:[%s1397_s0 + $0x130] sm:$0xff] }
   0xb   :  { %v21_v38 = vld [vmem:[%s1397_s0 + $0x38] sm:$0xff]  ;;  %v22_v40 = vld [vmem:[%s1397_s0 + $0x40] sm:$0xff]  ;;  %v23_v42 = vld [vmem:[%s1397_s0 + $0x48] sm:$0xff] }
   0xc   :  { %v53_v39 = vld [vmem:[%s1397_s0 + $0x138] sm:$0xff]  ;;  %v54_v41 = vld [vmem:[%s1397_s0 + $0x140] sm:$0xff]  ;;  %v55_v43 = vld [vmem:[%s1397_s0 + $0x148] sm:$0xff] }
   0xd   :  { %838 = vmatpush3.bf16.msra.mxu0 %v835_v8  ;;  %869 = vmatpush3.bf16.msra.mxu1 %v835_v8  ;;  %v24_v44 = vld [vmem:[%s1397_s0 + $0x50] sm:$0xff]  ;;  %v25_v46 = vld [vmem:[%s1397_s0 + $0x58] sm:$0xff]  ;;  %v26_v48 = vld [vmem:[%s1397_s0 + $0x60] sm:$0xff] }
   0xe   :  { %840 = vmatprep.subr.bf16.mxu0 %v839_v13  ;;  %862 = vmatprep.subr.bf16.mxu1 %v839_v13  ;;  %v56_v45 = vld [vmem:[%s1397_s0 + $0x150] sm:$0xff]  ;;  %v57_v47 = vld [vmem:[%s1397_s0 + $0x158] sm:$0xff]  ;;  %v58_v49 = vld [vmem:[%s1397_s0 + $0x160] sm:$0xff] }
   0xf   :  { %v27_v50 = vld [vmem:[%s1397_s0 + $0x68] sm:$0xff]  ;;  %v28_v52 = vld [vmem:[%s1397_s0 + $0x70] sm:$0xff]  ;;  %v29_v54 = vld [vmem:[%s1397_s0 + $0x78] sm:$0xff] }
  0x10   :  { %v59_v51 = vld [vmem:[%s1397_s0 + $0x168] sm:$0xff]  ;;  %v60_v53 = vld [vmem:[%s1397_s0 + $0x170] sm:$0xff]  ;;  %v61_v55 = vld [vmem:[%s1397_s0 + $0x178] sm:$0xff] }
  0x11   :  { %842 = vmatpush3.bf16.msra.mxu0 %v839_v13  ;;  %870 = vmatpush3.bf16.msra.mxu1 %v839_v13  ;;  %v30_v56 = vld [vmem:[%s1397_s0 + $0x80] sm:$0xff]  ;;  %v31_v58 = vld [vmem:[%s1397_s0 + $0x88] sm:$0xff]  ;;  %v32_v60 = vld [vmem:[%s1397_s0 + $0x90] sm:$0xff] }
  0x12   :  { %844 = vmatprep.subr.bf16.mxu0 %v843_v16  ;;  %863 = vmatprep.subr.bf16.mxu1 %v843_v16  ;;  %v62_v57 = vld [vmem:[%s1397_s0 + $0x180] sm:$0xff]  ;;  %v63_v59 = vld [vmem:[%s1397_s0 + $0x188] sm:$0xff]  ;;  %v64_v61 = vld [vmem:[%s1397_s0 + $0x190] sm:$0xff] }
  0x13   :  { %v33_v62 = vld [vmem:[%s1397_s0 + $0x98] sm:$0xff]  ;;  %v34_v0 = vld [vmem:[%s1397_s0 + $0xa0] sm:$0xff]  ;;  %v35_v2 = vld [vmem:[%s1397_s0 + $0xa8] sm:$0xff] }
  0x14   :  { %v65_v63 = vld [vmem:[%s1397_s0 + $0x198] sm:$0xff]  ;;  %v66_v1 = vld [vmem:[%s1397_s0 + $0x1a0] sm:$0xff]  ;;  %v67_v3 = vld [vmem:[%s1397_s0 + $0x1a8] sm:$0xff] }
  0x15   :  { %846 = vmatpush3.bf16.msra.mxu0 %v843_v16  ;;  %871 = vmatpush3.bf16.msra.mxu1 %v843_v16  ;;  %v36_v4 = vld [vmem:[%s1397_s0 + $0xb0] sm:$0xff]  ;;  %v37_v6 = vld [vmem:[%s1397_s0 + $0xb8] sm:$0xff]  ;;  %v38_v8 = vld [vmem:[%s1397_s0 + $0xc0] sm:$0xff] }
  0x16   :  { %848 = vmatprep.subr.bf16.mxu0 %v847_v19  ;;  %864 = vmatprep.subr.bf16.mxu1 %v847_v19  ;;  %v68_v5 = vld [vmem:[%s1397_s0 + $0x1b0] sm:$0xff]  ;;  %v69_v7 = vld [vmem:[%s1397_s0 + $0x1b8] sm:$0xff]  ;;  %v70_v9 = vld [vmem:[%s1397_s0 + $0x1c0] sm:$0xff] }
  0x17   :  { %v39_v10 = vld [vmem:[%s1397_s0 + $0xc8] sm:$0xff]  ;;  %v40_v12 = vld [vmem:[%s1397_s0 + $0xd0] sm:$0xff]  ;;  %v41_v14 = vld [vmem:[%s1397_s0 + $0xd8] sm:$0xff] }
  0x18   :  { %v71_v11 = vld [vmem:[%s1397_s0 + $0x1c8] sm:$0xff]  ;;  %v72_v13 = vld [vmem:[%s1397_s0 + $0x1d0] sm:$0xff]  ;;  %v73_v15 = vld [vmem:[%s1397_s0 + $0x1d8] sm:$0xff] }
  0x19   :  { %850 = vmatpush3.bf16.msra.mxu0 %v847_v19  ;;  %872 = vmatpush3.bf16.msra.mxu1 %v847_v19  ;;  %v42_v16 = vld [vmem:[%s1397_s0 + $0xe0] sm:$0xff]  ;;  %v43_v18 = vld [vmem:[%s1397_s0 + $0xe8] sm:$0xff]  ;;  %v44_v20 = vld [vmem:[%s1397_s0 + $0xf0] sm:$0xff] }
  0x1a   :  { %852 = vmatprep.subr.bf16.mxu0 %v851_v22  ;;  %865 = vmatprep.subr.bf16.mxu1 %v851_v22  ;;  %v74_v17 = vld [vmem:[%s1397_s0 + $0x1e0] sm:$0xff]  ;;  %v75_v19 = vld [vmem:[%s1397_s0 + $0x1e8] sm:$0xff]  ;;  %v76_v21 = vld [vmem:[%s1397_s0 + $0x1f0] sm:$0xff] }
  0x1b   :  { %v77_v23 = vld [vmem:[%s1397_s0 + $0x1f8] sm:$0xff]  ;;  %v1138_v24 = vld [vmem:[%s1398_s2] ss:$0 sm:$0xff] }
  0x1d   :  { %854 = vmatpush3.bf16.msra.mxu0 %v851_v22  ;;  %873 = vmatpush3.bf16.msra.mxu1 %v851_v22  ;;  %v45_v22 = vld [vmem:[%s1397_s0 + $0xf8] sm:$0xff] }
  0x1e   :  { %856 = vmatprep.subr.bf16.mxu0 %v855_v25  ;;  %866 = vmatprep.subr.bf16.mxu1 %v855_v25 }
  0x21   :  { %858 = vmatpush3.bf16.msra.mxu0 %v855_v25  ;;  %874 = vmatpush3.bf16.msra.mxu1 %v855_v25 }
  0x24   :  { %732 = vmatmul.mubr.f32.vlgmr.msra.gmra.mrb[0].mxu0 %v15_v26  ;;  %780 = vmatmul.mubr.f32.vlgmr.msra.gmra.mrb[0].mxu1 %v47_v27 }
  0x25   :  { %734 = vmatprep.mubr.f32.mxu0 %v16_v28  ;;  %782 = vmatprep.mubr.f32.mxu1 %v48_v29 }
  0x28   :  { %735 = vmatmul.mubr.f32.gmra.mrb[2].mxu0 %v17_v30  ;;  %783 = vmatmul.mubr.f32.gmra.mrb[2].mxu1 %v49_v31 }
  0x29   :  { %737 = vmatprep.mubr.f32.mxu0 %v18_v32  ;;  %785 = vmatprep.mubr.f32.mxu1 %v50_v33 }
  0x2c   :  { %738 = vmatmul.mubr.f32.gmra.mrb[4].mxu0 %v19_v34  ;;  %786 = vmatmul.mubr.f32.gmra.mrb[4].mxu1 %v51_v35 }
  0x2d   :  { %740 = vmatprep.mubr.f32.mxu0 %v20_v36  ;;  %788 = vmatprep.mubr.f32.mxu1 %v52_v37 }
  0x30   :  { %741 = vmatmul.mubr.f32.gmra.mrb[6].mxu0 %v21_v38  ;;  %789 = vmatmul.mubr.f32.gmra.mrb[6].mxu1 %v53_v39 }
  0x31   :  { %743 = vmatprep.mubr.f32.mxu0 %v22_v40  ;;  %791 = vmatprep.mubr.f32.mxu1 %v54_v41 }
  0x34   :  { %744 = vmatmul.mubr.f32.gmra.mrb[8].mxu0 %v23_v42  ;;  %792 = vmatmul.mubr.f32.gmra.mrb[8].mxu1 %v55_v43 }
  0x35   :  { %746 = vmatprep.mubr.f32.mxu0 %v24_v44  ;;  %794 = vmatprep.mubr.f32.mxu1 %v56_v45 }
  0x38   :  { %747 = vmatmul.mubr.f32.gmra.mrb[10].mxu0 %v25_v46  ;;  %795 = vmatmul.mubr.f32.gmra.mrb[10].mxu1 %v57_v47 }
  0x39   :  { %749 = vmatprep.mubr.f32.mxu0 %v26_v48  ;;  %797 = vmatprep.mubr.f32.mxu1 %v58_v49 }
  0x3c   :  { %750 = vmatmul.mubr.f32.gmra.mrb[12].mxu0 %v27_v50  ;;  %798 = vmatmul.mubr.f32.gmra.mrb[12].mxu1 %v59_v51 }
  0x3d   :  { %752 = vmatprep.mubr.f32.mxu0 %v28_v52  ;;  %800 = vmatprep.mubr.f32.mxu1 %v60_v53 }
  0x40   :  { %753 = vmatmul.mubr.f32.gmra.mrb[14].mxu0 %v29_v54  ;;  %801 = vmatmul.mubr.f32.gmra.mrb[14].mxu1 %v61_v55 }
  0x41   :  { %755 = vmatprep.mubr.f32.mxu0 %v30_v56  ;;  %803 = vmatprep.mubr.f32.mxu1 %v62_v57 }
  0x44   :  { %756 = vmatmul.mubr.f32.gmra.mrb[16].mxu0 %v31_v58  ;;  %804 = vmatmul.mubr.f32.gmra.mrb[16].mxu1 %v63_v59 }
  0x45   :  { %758 = vmatprep.mubr.f32.mxu0 %v32_v60  ;;  %806 = vmatprep.mubr.f32.mxu1 %v64_v61 }
  0x48   :  { %759 = vmatmul.mubr.f32.gmra.mrb[18].mxu0 %v33_v62  ;;  %807 = vmatmul.mubr.f32.gmra.mrb[18].mxu1 %v65_v63 }
  0x49   :  { %761 = vmatprep.mubr.f32.mxu0 %v34_v0  ;;  %809 = vmatprep.mubr.f32.mxu1 %v66_v1 }
  0x4c   :  { %762 = vmatmul.mubr.f32.gmra.mrb[20].mxu0 %v35_v2  ;;  %810 = vmatmul.mubr.f32.gmra.mrb[20].mxu1 %v67_v3 }
  0x4d   :  { %764 = vmatprep.mubr.f32.mxu0 %v36_v4  ;;  %812 = vmatprep.mubr.f32.mxu1 %v68_v5 }
  0x50   :  { %765 = vmatmul.mubr.f32.gmra.mrb[22].mxu0 %v37_v6  ;;  %813 = vmatmul.mubr.f32.gmra.mrb[22].mxu1 %v69_v7 }
  0x51   :  { %767 = vmatprep.mubr.f32.mxu0 %v38_v8  ;;  %815 = vmatprep.mubr.f32.mxu1 %v70_v9 }
  0x54   :  { %768 = vmatmul.mubr.f32.gmra.mrb[24].mxu0 %v39_v10  ;;  %816 = vmatmul.mubr.f32.gmra.mrb[24].mxu1 %v71_v11 }
  0x55   :  { %770 = vmatprep.mubr.f32.mxu0 %v40_v12  ;;  %818 = vmatprep.mubr.f32.mxu1 %v72_v13 }
  0x58   :  { %771 = vmatmul.mubr.f32.gmra.mrb[26].mxu0 %v41_v14  ;;  %819 = vmatmul.mubr.f32.gmra.mrb[26].mxu1 %v73_v15 }
  0x59   :  { %773 = vmatprep.mubr.f32.mxu0 %v42_v16  ;;  %821 = vmatprep.mubr.f32.mxu1 %v74_v17 }
  0x5c   :  { %774 = vmatmul.mubr.f32.gmra.mrb[28].mxu0 %v43_v18  ;;  %822 = vmatmul.mubr.f32.gmra.mrb[28].mxu1 %v75_v19 }
  0x5d   :  { %776 = vmatprep.mubr.f32.mxu0 %v44_v20  ;;  %824 = vmatprep.mubr.f32.mxu1 %v76_v21 }
  0x60   :  { %777 = vmatmul.mubr.f32.gmra.mrb[30].mxu0 %v45_v22  ;;  %825 = vmatmul.mubr.f32.gmra.mrb[30].mxu1 %v77_v23 }
  0xf7   :  { %v733_v25 = vpop.f32.mrb[0].mxu0  ;;  %v781_v26 = vpop.f32.mrb[0].mxu1 }
  0xf8   :  { %v173_v27 = vadd.f32 %v733_v25, %v1138_v24  ;;  %v333_v28 = vadd.f32 %v781_v26, %v1138_v24  ;;  %v167_v29 = vpop.f32.mrb[1].mxu0  ;;  %v327_v30 = vpop.f32.mrb[1].mxu1 }
  0xf9   :  { %v168_v31 = vadd.f32 %v1138_v24, %v167_v29  ;;  %v328_v32 = vadd.f32 %v1138_v24, %v327_v30 }
  0xfa   :  { %v487_v33 = vmax.f32 %v173_v27, 0.0  ;;  %v519_v34 = vmax.f32 %v333_v28, 0.0 }
  0xfb   :  { %v486_v35 = vmax.f32 %v168_v31, 0.0  ;;  %v518_v36 = vmax.f32 %v328_v32, 0.0  ;;  %v736_v37 = vpop.f32.mrb[2].mxu0  ;;  %v784_v38 = vpop.f32.mrb[2].mxu1 }
  0xfc   :  { %551 = vst [vmem:[%s1399_s3 + $0x8] sm:$0xff] %v487_v33  ;;  %583 = vst [vmem:[%s1399_s3 + $0x108] sm:$0xff] %v519_v34  ;;  %v183_v39 = vadd.f32 %v736_v37, %v1138_v24  ;;  %v343_v40 = vadd.f32 %v784_v38, %v1138_v24  ;;  %v177_v41 = vpop.f32.mrb[3].mxu0  ;;  %v337_v42 = vpop.f32.mrb[3].mxu1 }
  0xfd   :  { %550 = vst [vmem:[%s1399_s3] sm:$0xff] %v486_v35  ;;  %582 = vst [vmem:[%s1399_s3 + $0x100] sm:$0xff] %v518_v36  ;;  %v178_v43 = vadd.f32 %v1138_v24, %v177_v41  ;;  %v338_v44 = vadd.f32 %v1138_v24, %v337_v42 }
  0xfe   :  { %v489_v45 = vmax.f32 %v183_v39, 0.0  ;;  %v521_v46 = vmax.f32 %v343_v40, 0.0 }
  0xff   :  { %v488_v47 = vmax.f32 %v178_v43, 0.0  ;;  %v520_v48 = vmax.f32 %v338_v44, 0.0  ;;  %v739_v49 = vpop.f32.mrb[4].mxu0  ;;  %v787_v50 = vpop.f32.mrb[4].mxu1 }
 0x100   :  { %553 = vst [vmem:[%s1399_s3 + $0x18] sm:$0xff] %v489_v45  ;;  %585 = vst [vmem:[%s1399_s3 + $0x118] sm:$0xff] %v521_v46  ;;  %v193_v51 = vadd.f32 %v739_v49, %v1138_v24  ;;  %v353_v52 = vadd.f32 %v787_v50, %v1138_v24  ;;  %v187_v53 = vpop.f32.mrb[5].mxu0  ;;  %v347_v54 = vpop.f32.mrb[5].mxu1 }
 0x101   :  { %552 = vst [vmem:[%s1399_s3 + $0x10] sm:$0xff] %v488_v47  ;;  %584 = vst [vmem:[%s1399_s3 + $0x110] sm:$0xff] %v520_v48  ;;  %v188_v55 = vadd.f32 %v1138_v24, %v187_v53  ;;  %v348_v56 = vadd.f32 %v1138_v24, %v347_v54 }
 0x102   :  { %v491_v57 = vmax.f32 %v193_v51, 0.0  ;;  %v523_v58 = vmax.f32 %v353_v52, 0.0 }
 0x103   :  { %v490_v59 = vmax.f32 %v188_v55, 0.0  ;;  %v522_v60 = vmax.f32 %v348_v56, 0.0  ;;  %v742_v61 = vpop.f32.mrb[6].mxu0  ;;  %v790_v62 = vpop.f32.mrb[6].mxu1 }
 0x104   :  { %555 = vst [vmem:[%s1399_s3 + $0x28] sm:$0xff] %v491_v57  ;;  %587 = vst [vmem:[%s1399_s3 + $0x128] sm:$0xff] %v523_v58  ;;  %v203_v63 = vadd.f32 %v742_v61, %v1138_v24  ;;  %v363_v0 = vadd.f32 %v790_v62, %v1138_v24  ;;  %v197_v1 = vpop.f32.mrb[7].mxu0  ;;  %v357_v2 = vpop.f32.mrb[7].mxu1 }
 0x105   :  { %554 = vst [vmem:[%s1399_s3 + $0x20] sm:$0xff] %v490_v59  ;;  %586 = vst [vmem:[%s1399_s3 + $0x120] sm:$0xff] %v522_v60  ;;  %v198_v3 = vadd.f32 %v1138_v24, %v197_v1  ;;  %v358_v4 = vadd.f32 %v1138_v24, %v357_v2 }
 0x106   :  { %v493_v5 = vmax.f32 %v203_v63, 0.0  ;;  %v525_v6 = vmax.f32 %v363_v0, 0.0 }
 0x107   :  { %v492_v7 = vmax.f32 %v198_v3, 0.0  ;;  %v524_v8 = vmax.f32 %v358_v4, 0.0  ;;  %v745_v9 = vpop.f32.mrb[8].mxu0  ;;  %v793_v10 = vpop.f32.mrb[8].mxu1 }
 0x108   :  { %557 = vst [vmem:[%s1399_s3 + $0x38] sm:$0xff] %v493_v5  ;;  %589 = vst [vmem:[%s1399_s3 + $0x138] sm:$0xff] %v525_v6  ;;  %v213_v11 = vadd.f32 %v745_v9, %v1138_v24  ;;  %v373_v12 = vadd.f32 %v793_v10, %v1138_v24  ;;  %v207_v13 = vpop.f32.mrb[9].mxu0  ;;  %v367_v14 = vpop.f32.mrb[9].mxu1 }
 0x109   :  { %556 = vst [vmem:[%s1399_s3 + $0x30] sm:$0xff] %v492_v7  ;;  %588 = vst [vmem:[%s1399_s3 + $0x130] sm:$0xff] %v524_v8  ;;  %v208_v15 = vadd.f32 %v1138_v24, %v207_v13  ;;  %v368_v16 = vadd.f32 %v1138_v24, %v367_v14 }
 0x10a   :  { %v495_v17 = vmax.f32 %v213_v11, 0.0  ;;  %v527_v18 = vmax.f32 %v373_v12, 0.0 }
 0x10b   :  { %v494_v19 = vmax.f32 %v208_v15, 0.0  ;;  %v526_v20 = vmax.f32 %v368_v16, 0.0  ;;  %v748_v21 = vpop.f32.mrb[10].mxu0  ;;  %v796_v22 = vpop.f32.mrb[10].mxu1 }
 0x10c   :  { %559 = vst [vmem:[%s1399_s3 + $0x48] sm:$0xff] %v495_v17  ;;  %591 = vst [vmem:[%s1399_s3 + $0x148] sm:$0xff] %v527_v18  ;;  %v223_v23 = vadd.f32 %v748_v21, %v1138_v24  ;;  %v383_v25 = vadd.f32 %v796_v22, %v1138_v24  ;;  %v217_v26 = vpop.f32.mrb[11].mxu0  ;;  %v377_v27 = vpop.f32.mrb[11].mxu1 }
 0x10d   :  { %558 = vst [vmem:[%s1399_s3 + $0x40] sm:$0xff] %v494_v19  ;;  %590 = vst [vmem:[%s1399_s3 + $0x140] sm:$0xff] %v526_v20  ;;  %v218_v28 = vadd.f32 %v1138_v24, %v217_v26  ;;  %v378_v29 = vadd.f32 %v1138_v24, %v377_v27 }
 0x10e   :  { %v497_v30 = vmax.f32 %v223_v23, 0.0  ;;  %v529_v31 = vmax.f32 %v383_v25, 0.0 }
 0x10f   :  { %v496_v32 = vmax.f32 %v218_v28, 0.0  ;;  %v528_v33 = vmax.f32 %v378_v29, 0.0  ;;  %v751_v34 = vpop.f32.mrb[12].mxu0  ;;  %v799_v35 = vpop.f32.mrb[12].mxu1 }
 0x110   :  { %561 = vst [vmem:[%s1399_s3 + $0x58] sm:$0xff] %v497_v30  ;;  %593 = vst [vmem:[%s1399_s3 + $0x158] sm:$0xff] %v529_v31  ;;  %v233_v36 = vadd.f32 %v751_v34, %v1138_v24  ;;  %v393_v37 = vadd.f32 %v799_v35, %v1138_v24  ;;  %v227_v38 = vpop.f32.mrb[13].mxu0  ;;  %v387_v39 = vpop.f32.mrb[13].mxu1 }
 0x111   :  { %560 = vst [vmem:[%s1399_s3 + $0x50] sm:$0xff] %v496_v32  ;;  %592 = vst [vmem:[%s1399_s3 + $0x150] sm:$0xff] %v528_v33  ;;  %v228_v40 = vadd.f32 %v1138_v24, %v227_v38  ;;  %v388_v41 = vadd.f32 %v1138_v24, %v387_v39 }
 0x112   :  { %v499_v42 = vmax.f32 %v233_v36, 0.0  ;;  %v531_v43 = vmax.f32 %v393_v37, 0.0 }
 0x113   :  { %v498_v44 = vmax.f32 %v228_v40, 0.0  ;;  %v530_v45 = vmax.f32 %v388_v41, 0.0  ;;  %v754_v46 = vpop.f32.mrb[14].mxu0  ;;  %v802_v47 = vpop.f32.mrb[14].mxu1 }
 0x114   :  { %563 = vst [vmem:[%s1399_s3 + $0x68] sm:$0xff] %v499_v42  ;;  %595 = vst [vmem:[%s1399_s3 + $0x168] sm:$0xff] %v531_v43  ;;  %v243_v48 = vadd.f32 %v754_v46, %v1138_v24  ;;  %v403_v49 = vadd.f32 %v802_v47, %v1138_v24  ;;  %v237_v50 = vpop.f32.mrb[15].mxu0  ;;  %v397_v51 = vpop.f32.mrb[15].mxu1 }
 0x115   :  { %562 = vst [vmem:[%s1399_s3 + $0x60] sm:$0xff] %v498_v44  ;;  %594 = vst [vmem:[%s1399_s3 + $0x160] sm:$0xff] %v530_v45  ;;  %v238_v52 = vadd.f32 %v1138_v24, %v237_v50  ;;  %v398_v53 = vadd.f32 %v1138_v24, %v397_v51 }
 0x116   :  { %v501_v54 = vmax.f32 %v243_v48, 0.0  ;;  %v533_v55 = vmax.f32 %v403_v49, 0.0 }
 0x117   :  { %v500_v56 = vmax.f32 %v238_v52, 0.0  ;;  %v532_v57 = vmax.f32 %v398_v53, 0.0  ;;  %v757_v58 = vpop.f32.mrb[16].mxu0  ;;  %v805_v59 = vpop.f32.mrb[16].mxu1 }
 0x118   :  { %565 = vst [vmem:[%s1399_s3 + $0x78] sm:$0xff] %v501_v54  ;;  %597 = vst [vmem:[%s1399_s3 + $0x178] sm:$0xff] %v533_v55  ;;  %v253_v60 = vadd.f32 %v757_v58, %v1138_v24  ;;  %v413_v61 = vadd.f32 %v805_v59, %v1138_v24  ;;  %v247_v62 = vpop.f32.mrb[17].mxu0  ;;  %v407_v63 = vpop.f32.mrb[17].mxu1 }
 0x119   :  { %564 = vst [vmem:[%s1399_s3 + $0x70] sm:$0xff] %v500_v56  ;;  %596 = vst [vmem:[%s1399_s3 + $0x170] sm:$0xff] %v532_v57  ;;  %v248_v0 = vadd.f32 %v1138_v24, %v247_v62  ;;  %v408_v1 = vadd.f32 %v1138_v24, %v407_v63 }
 0x11a   :  { %v503_v2 = vmax.f32 %v253_v60, 0.0  ;;  %v535_v3 = vmax.f32 %v413_v61, 0.0 }
 0x11b   :  { %v502_v4 = vmax.f32 %v248_v0, 0.0  ;;  %v534_v5 = vmax.f32 %v408_v1, 0.0  ;;  %v760_v6 = vpop.f32.mrb[18].mxu0  ;;  %v808_v7 = vpop.f32.mrb[18].mxu1 }
 0x11c   :  { %567 = vst [vmem:[%s1399_s3 + $0x88] sm:$0xff] %v503_v2  ;;  %599 = vst [vmem:[%s1399_s3 + $0x188] sm:$0xff] %v535_v3  ;;  %v263_v8 = vadd.f32 %v760_v6, %v1138_v24  ;;  %v423_v9 = vadd.f32 %v808_v7, %v1138_v24  ;;  %v257_v10 = vpop.f32.mrb[19].mxu0  ;;  %v417_v11 = vpop.f32.mrb[19].mxu1 }
 0x11d   :  { %566 = vst [vmem:[%s1399_s3 + $0x80] sm:$0xff] %v502_v4  ;;  %598 = vst [vmem:[%s1399_s3 + $0x180] sm:$0xff] %v534_v5  ;;  %v258_v12 = vadd.f32 %v1138_v24, %v257_v10  ;;  %v418_v13 = vadd.f32 %v1138_v24, %v417_v11 }
 0x11e   :  { %v505_v14 = vmax.f32 %v263_v8, 0.0  ;;  %v537_v15 = vmax.f32 %v423_v9, 0.0 }
 0x11f   :  { %v504_v16 = vmax.f32 %v258_v12, 0.0  ;;  %v536_v17 = vmax.f32 %v418_v13, 0.0  ;;  %v763_v18 = vpop.f32.mrb[20].mxu0  ;;  %v811_v19 = vpop.f32.mrb[20].mxu1 }
 0x120   :  { %569 = vst [vmem:[%s1399_s3 + $0x98] sm:$0xff] %v505_v14  ;;  %601 = vst [vmem:[%s1399_s3 + $0x198] sm:$0xff] %v537_v15  ;;  %v273_v20 = vadd.f32 %v763_v18, %v1138_v24  ;;  %v433_v21 = vadd.f32 %v811_v19, %v1138_v24  ;;  %v267_v22 = vpop.f32.mrb[21].mxu0  ;;  %v427_v23 = vpop.f32.mrb[21].mxu1 }
 0x121   :  { %568 = vst [vmem:[%s1399_s3 + $0x90] sm:$0xff] %v504_v16  ;;  %600 = vst [vmem:[%s1399_s3 + $0x190] sm:$0xff] %v536_v17  ;;  %v268_v25 = vadd.f32 %v1138_v24, %v267_v22  ;;  %v428_v26 = vadd.f32 %v1138_v24, %v427_v23 }
 0x122   :  { %v507_v27 = vmax.f32 %v273_v20, 0.0  ;;  %v539_v28 = vmax.f32 %v433_v21, 0.0 }
 0x123   :  { %v506_v29 = vmax.f32 %v268_v25, 0.0  ;;  %v538_v30 = vmax.f32 %v428_v26, 0.0  ;;  %v766_v31 = vpop.f32.mrb[22].mxu0  ;;  %v814_v32 = vpop.f32.mrb[22].mxu1 }
 0x124   :  { %571 = vst [vmem:[%s1399_s3 + $0xa8] sm:$0xff] %v507_v27  ;;  %603 = vst [vmem:[%s1399_s3 + $0x1a8] sm:$0xff] %v539_v28  ;;  %v283_v33 = vadd.f32 %v766_v31, %v1138_v24  ;;  %v443_v34 = vadd.f32 %v814_v32, %v1138_v24  ;;  %v277_v35 = vpop.f32.mrb[23].mxu0  ;;  %v437_v36 = vpop.f32.mrb[23].mxu1 }
 0x125   :  { %570 = vst [vmem:[%s1399_s3 + $0xa0] sm:$0xff] %v506_v29  ;;  %602 = vst [vmem:[%s1399_s3 + $0x1a0] sm:$0xff] %v538_v30  ;;  %v278_v37 = vadd.f32 %v1138_v24, %v277_v35  ;;  %v438_v38 = vadd.f32 %v1138_v24, %v437_v36 }
 0x126   :  { %v509_v39 = vmax.f32 %v283_v33, 0.0  ;;  %v541_v40 = vmax.f32 %v443_v34, 0.0 }
 0x127   :  { %v508_v41 = vmax.f32 %v278_v37, 0.0  ;;  %v540_v42 = vmax.f32 %v438_v38, 0.0  ;;  %v769_v43 = vpop.f32.mrb[24].mxu0  ;;  %v817_v44 = vpop.f32.mrb[24].mxu1 }
 0x128   :  { %573 = vst [vmem:[%s1399_s3 + $0xb8] sm:$0xff] %v509_v39  ;;  %605 = vst [vmem:[%s1399_s3 + $0x1b8] sm:$0xff] %v541_v40  ;;  %v293_v45 = vadd.f32 %v769_v43, %v1138_v24  ;;  %v453_v46 = vadd.f32 %v817_v44, %v1138_v24  ;;  %v287_v47 = vpop.f32.mrb[25].mxu0  ;;  %v447_v48 = vpop.f32.mrb[25].mxu1 }
 0x129   :  { %572 = vst [vmem:[%s1399_s3 + $0xb0] sm:$0xff] %v508_v41  ;;  %604 = vst [vmem:[%s1399_s3 + $0x1b0] sm:$0xff] %v540_v42  ;;  %v288_v49 = vadd.f32 %v1138_v24, %v287_v47  ;;  %v448_v50 = vadd.f32 %v1138_v24, %v447_v48 }
 0x12a   :  { %v511_v51 = vmax.f32 %v293_v45, 0.0  ;;  %v543_v52 = vmax.f32 %v453_v46, 0.0 }
 0x12b   :  { %v510_v53 = vmax.f32 %v288_v49, 0.0  ;;  %v542_v54 = vmax.f32 %v448_v50, 0.0  ;;  %v772_v55 = vpop.f32.mrb[26].mxu0  ;;  %v820_v56 = vpop.f32.mrb[26].mxu1 }
 0x12c   :  { %575 = vst [vmem:[%s1399_s3 + $0xc8] sm:$0xff] %v511_v51  ;;  %607 = vst [vmem:[%s1399_s3 + $0x1c8] sm:$0xff] %v543_v52  ;;  %v303_v57 = vadd.f32 %v772_v55, %v1138_v24  ;;  %v463_v58 = vadd.f32 %v820_v56, %v1138_v24  ;;  %v297_v59 = vpop.f32.mrb[27].mxu0  ;;  %v457_v60 = vpop.f32.mrb[27].mxu1 }
 0x12d   :  { %574 = vst [vmem:[%s1399_s3 + $0xc0] sm:$0xff] %v510_v53  ;;  %606 = vst [vmem:[%s1399_s3 + $0x1c0] sm:$0xff] %v542_v54  ;;  %v298_v61 = vadd.f32 %v1138_v24, %v297_v59  ;;  %v458_v62 = vadd.f32 %v1138_v24, %v457_v60 }
 0x12e   :  { %v513_v63 = vmax.f32 %v303_v57, 0.0  ;;  %v545_v0 = vmax.f32 %v463_v58, 0.0 }
 0x12f   :  { %v512_v1 = vmax.f32 %v298_v61, 0.0  ;;  %v544_v2 = vmax.f32 %v458_v62, 0.0  ;;  %v775_v3 = vpop.f32.mrb[28].mxu0  ;;  %v823_v4 = vpop.f32.mrb[28].mxu1 }
 0x130   :  { %577 = vst [vmem:[%s1399_s3 + $0xd8] sm:$0xff] %v513_v63  ;;  %609 = vst [vmem:[%s1399_s3 + $0x1d8] sm:$0xff] %v545_v0  ;;  %v313_v5 = vadd.f32 %v775_v3, %v1138_v24  ;;  %v473_v6 = vadd.f32 %v823_v4, %v1138_v24  ;;  %v307_v7 = vpop.f32.mrb[29].mxu0  ;;  %v467_v8 = vpop.f32.mrb[29].mxu1 }
 0x131   :  { %576 = vst [vmem:[%s1399_s3 + $0xd0] sm:$0xff] %v512_v1  ;;  %608 = vst [vmem:[%s1399_s3 + $0x1d0] sm:$0xff] %v544_v2  ;;  %v308_v9 = vadd.f32 %v1138_v24, %v307_v7  ;;  %v468_v10 = vadd.f32 %v1138_v24, %v467_v8 }
 0x132   :  { %v515_v11 = vmax.f32 %v313_v5, 0.0  ;;  %v547_v12 = vmax.f32 %v473_v6, 0.0 }
 0x133   :  { %v514_v13 = vmax.f32 %v308_v9, 0.0  ;;  %v546_v14 = vmax.f32 %v468_v10, 0.0  ;;  %v778_v15 = vpop.f32.mrb[30].mxu0  ;;  %v826_v16 = vpop.f32.mrb[30].mxu1 }
 0x134   :  { %579 = vst [vmem:[%s1399_s3 + $0xe8] sm:$0xff] %v515_v11  ;;  %611 = vst [vmem:[%s1399_s3 + $0x1e8] sm:$0xff] %v547_v12  ;;  %v323_v17 = vadd.f32 %v778_v15, %v1138_v24  ;;  %v483_v18 = vadd.f32 %v826_v16, %v1138_v24  ;;  %v317_v19 = vpop.f32.mrb[31].mxu0  ;;  %v477_v20 = vpop.f32.mrb[31].mxu1 }
 0x135   :  { %578 = vst [vmem:[%s1399_s3 + $0xe0] sm:$0xff] %v514_v13  ;;  %610 = vst [vmem:[%s1399_s3 + $0x1e0] sm:$0xff] %v546_v14  ;;  %v318_v21 = vadd.f32 %v1138_v24, %v317_v19  ;;  %v478_v22 = vadd.f32 %v1138_v24, %v477_v20 }
 0x136   :  { %v517_v23 = vmax.f32 %v323_v17, 0.0  ;;  %v549_v25 = vmax.f32 %v483_v18, 0.0 }
 0x137   :  { %v516_v26 = vmax.f32 %v318_v21, 0.0  ;;  %v548_v27 = vmax.f32 %v478_v22, 0.0 }
 0x138   :  { %581 = vst [vmem:[%s1399_s3 + $0xf8] sm:$0xff] %v517_v23  ;;  %613 = vst [vmem:[%s1399_s3 + $0x1f8] sm:$0xff] %v549_v25 }
 0x139   :  { %580 = vst [vmem:[%s1399_s3 + $0xf0] sm:$0xff] %v516_v26  ;;  %612 = vst [vmem:[%s1399_s3 + $0x1f0] sm:$0xff] %v548_v27 }

</bundles_post_ra>
